<compile_context>
chip_gen: v6e
topology: v6e:2x2x1
jax: 0.10.0
libtpu: 0.0.40
codegen_flags: <defaults>
</compile_context>

<pallas_src>
import functools
import math

import jax
import jax.numpy as jnp
from jax.experimental import pallas as pl
from jax.experimental.pallas import tpu as pltpu


def _round_up(x: int, m: int) -> int:
    return ((x + m - 1) // m) * m


def _sublane(dtype) -> int:
    # Rows per packed 32-bit sublane group: 8 f32, 16 bf16, 32 int8/fp8.
    return 8 * max(1, 4 // jnp.dtype(dtype).itemsize)


def _vmem_capacity_bytes() -> int:
    """Per-TensorCore VMEM capacity; conservative (v7x-class) fallback."""
    try:
        info = pltpu.get_tpu_info()
        cap = getattr(info, "vmem_capacity_bytes", None)
        if cap:
            return int(cap)
    except Exception:
        pass
    return 64 << 20


def make_pe(d_model: int, max_len: int = 5000, dtype=jnp.float32):
    """Deterministic buffer init matching PyTorch __init__ exactly."""
    position = jnp.arange(max_len, dtype=jnp.float32)[:, None]                 # (max_len, 1)
    div_term = jnp.exp(
        jnp.arange(0, d_model, 2, dtype=jnp.float32) * (-math.log(10000.0) / d_model)
    )                                                                          # (d_model//2,)
    ang = position * div_term                                                  # (max_len, d_model//2)
    pe = jnp.zeros((max_len, 1, d_model), dtype=jnp.float32)
    pe = pe.at[:, 0, 0::2].set(jnp.sin(ang))
    pe = pe.at[:, 0, 1::2].set(jnp.cos(ang))
    return pe.astype(dtype)


def _add_pe_kernel(x_ref, pe_ref, o_ref, *, reps: int):
    # x_ref/o_ref: (ts, B*D)   pe_ref: (ts, D)   -- all 2-D, sequence on sublanes.
    pe = pe_ref[...].astype(x_ref.dtype)          # in-kernel cast: free, hidden under DMA
    if reps > 1:
        pe = jnp.tile(pe, (1, reps))              # lane-axis replication across batch
    o_ref[...] = x_ref[...] + pe


def _choose_ts(s_rows: int, row_bytes: int, target_bytes: int,
               sublane_req: int, two_tc: bool) -> int:
    """Rows per grid step.  Caller guarantees s_rows >= 8.  Result is a
    multiple of 8 (pe-block constraint), preferably of the x dtype's sublane
    count, and capped at s_rows."""
    ts = int(target_bytes // max(row_bytes, 1))
    if two_tc and ts >= s_rows and s_rows >= 2 * sublane_req:
        # One step would cover everything: split into two near-equal,
        # sublane-aligned halves so both TensorCores stream concurrently.
        ts = _round_up(-(-s_rows // 2), sublane_req)
    ts = max(8, min(ts, s_rows))
    step = sublane_req if ts >= sublane_req else 8
    ts -= ts % step
    return ts


def position_encoding(x: jax.Array, pe: jax.Array, *,
                      target_tile_bytes: int | None = None,
                      donate_x: bool = False) -> jax.Array:
    """Forward: x + pe[:S].  x: [S, B, D], pe: [max_len, 1, D].

    If donate_x=True the caller's jax.jit must also donate x (donate_argnums),
    otherwise XLA inserts a defensive copy and the aliasing win is lost.
    """
    S, B, D = x.shape
    ML = pe.shape[0]
    assert pe.ndim == 3 and pe.shape[1] == 1 and pe.shape[2] == D, pe.shape
    assert ML >= S, (pe.shape, S)

    x_isz = jnp.dtype(x.dtype).itemsize
    pe_isz = jnp.dtype(pe.dtype).itemsize

    vmem_cap = _vmem_capacity_bytes()
    two_tc = vmem_cap <= (64 << 20)               # v7x-class: 64 MiB VMEM, 2 TCs
    if target_tile_bytes is None:
        target_tile_bytes = (4 << 20) if two_tc else (8 << 20)

    # Lane-dense 2-D views (free reshapes, row-major contiguous).
    reps = B
    x2 = x.reshape(S, B * D)
    pe2 = pe.reshape(ML, D)
    s_rows, row_w, pe_w = S, B * D, D

    if B == 1 and D % 128 != 0:
        # Fold k rows into lanes so stores are full 128-lane vst.
        k = 128 // math.gcd(D, 128)
        if k > 1 and S % k == 0 and ML % k == 0:
            x2 = x2.reshape(S // k, k * D)
            pe2 = pe2.reshape(ML // k, k * D)
            s_rows, row_w, pe_w = S // k, k * D, k * D

    x_sub = _sublane(x.dtype)
    pe_sub = _sublane(pe.dtype)
    sublane_req = max(x_sub, pe_sub, 8)

    if s_rows < 8:
        # Tiny-sequence path: one block covering everything.  pe must be sliced
        # so its block equals its full extent (a < 8-row block into the big pe
        # buffer would violate the sublane constraint).  Slice is < 8 rows.
        pe2 = pe2[:s_rows]
        ts = s_rows
    else:
        x_row_bytes = _round_up(row_w, 128) * x_isz
        ts = _choose_ts(s_rows, x_row_bytes, target_tile_bytes, sublane_req, two_tc)

    grid = (pl.cdiv(s_rows, ts),)

    # VMEM budget: double-buffered x-in, pe-in and out tiles + margin.
    # Never request the entire physical VMEM (leave compiler-scratch headroom).
    x_tile = _round_up(ts, x_sub) * _round_up(row_w, 128) * x_isz
    pe_tile = _round_up(ts, pe_sub) * _round_up(pe_w, 128) * pe_isz
    pipeline_bytes = 2 * (2 * x_tile + pe_tile)
    vmem_limit = int(min(vmem_cap - (8 << 20),
                         max(32 << 20, pipeline_bytes + (4 << 20))))

    cost = pl.CostEstimate(
        flops=int(S) * int(B) * int(D),
        transcendentals=0,
        bytes_accessed=int(2 * S * B * D * x_isz + S * D * pe_isz),
    )

    kwargs = {}
    if donate_x:
        kwargs["input_output_aliases"] = {0: 0}   # reuse x's HBM buffer for out

    out2 = pl.pallas_call(
        functools.partial(_add_pe_kernel, reps=reps),
        out_shape=jax.ShapeDtypeStruct((s_rows, row_w), x.dtype),
        grid=grid,
        in_specs=[pl.BlockSpec((ts, row_w), lambda i: (i, 0)),
                  pl.BlockSpec((ts, pe_w), lambda i: (i, 0))],
        out_specs=pl.BlockSpec((ts, row_w), lambda i: (i, 0)),
        compiler_params=pltpu.CompilerParams(
            dimension_semantics=("parallel",),
            vmem_limit_bytes=vmem_limit,
        ),
        cost_estimate=cost,
        **kwargs,
    )(x2, pe2)

    return out2.reshape(S, B, D)


if __name__ == "__main__":
    key = jax.random.PRNGKey(0)
    max_len = 64

    # (seq_len, batch, d_model, dtype):
    #   - B>1 lane-tiled pe, single step
    #   - B>1, multi-step with partial trailing block (masked stores)
    #   - B==1 row-fold into lanes (D<128)
    #   - B==1 already lane-dense (D==128)
    #   - bf16: in-kernel pe cast + dtype-sublane (16) tile rounding
    cases = [
        (8, 2, 32, jnp.float32),
        (20, 2, 32, jnp.float32),
        (16, 1, 32, jnp.float32),
        (32, 1, 128, jnp.float32),
        (24, 3, 32, jnp.bfloat16),
    ]
    for i, (S, B, D, dt) in enumerate(cases):
        pe = make_pe(D, max_len)
        k = jax.random.fold_in(key, i)
        x = jax.random.normal(k, (S, B, D), dtype=jnp.float32).astype(dt)

        out = jax.block_until_ready(position_encoding(x, pe))

        ref = x + pe[:S].astype(dt)
        assert out.shape == (S, B, D), out.shape
        assert out.dtype == dt, out.dtype
        tol = 1e-6 if dt == jnp.float32 else 2e-2
        assert jnp.allclose(out.astype(jnp.float32), ref.astype(jnp.float32),
                            atol=tol, rtol=tol), (S, B, D, dt)

    print("KERNEL_OK")
</pallas_src>

<mosaic_0001>
module attributes {stable_mosaic.version = 11 : i64} {
  func.func @_add_pe_kernel(%arg0: i32, %arg1: memref<8x64xf32, #tpu.memory_space<vmem>>, %arg2: memref<8x32xf32, #tpu.memory_space<vmem>>, %arg3: memref<8x64xf32, #tpu.memory_space<vmem>>) attributes {dimension_semantics = [#tpu.dimension_semantics<parallel>], iteration_bounds = array<i64: 1>, scalar_prefetch = 0 : i64, scratch_operands = 0 : i64, tpu.core_type = #tpu.core_type<tc>, window_params = [{transform_indices = @transform_0, window_bounds = array<i64: 8, 64>}, {transform_indices = @transform_1, window_bounds = array<i64: 8, 32>}, {transform_indices = @transform_2, window_bounds = array<i64: 8, 64>}]} {
    %c0 = arith.constant 0 : index
    %c0_0 = arith.constant 0 : index
    %0 = vector.load %arg2[%c0, %c0_0] : memref<8x32xf32, #tpu.memory_space<vmem>>, vector<8x32xf32>
    %1 = tpu.concatenate %0, %0 in 1 : vector<8x32xf32>, vector<8x32xf32> -> vector<8x64xf32>
    %c0_1 = arith.constant 0 : index
    %c0_2 = arith.constant 0 : index
    %2 = vector.load %arg1[%c0_1, %c0_2] : memref<8x64xf32, #tpu.memory_space<vmem>>, vector<8x64xf32>
    %3 = arith.addf %2, %1 : vector<8x64xf32>
    %c0_3 = arith.constant 0 : index
    %c0_4 = arith.constant 0 : index
    %4 = vector.load %arg3[%c0_3, %c0_4] : memref<8x64xf32, #tpu.memory_space<vmem>>, vector<8x64xf32>
    tpu.vector_store %arg3[%c0_3, %c0_4], %3 {strides = array<i32>} : memref<8x64xf32, #tpu.memory_space<vmem>>, vector<8x64xf32>,
    return
  }
  func.func @transform_0(%arg0: i32) -> (i32, i32) {
    %c0_i32 = arith.constant 0 : i32
    %c0_i32_0 = arith.constant 0 : i32
    return %arg0, %c0_i32 : i32, i32
  }
  func.func @transform_1(%arg0: i32) -> (i32, i32) {
    %c0_i32 = arith.constant 0 : i32
    %c0_i32_0 = arith.constant 0 : i32
    return %arg0, %c0_i32 : i32, i32
  }
  func.func @transform_2(%arg0: i32) -> (i32, i32) {
    %c0_i32 = arith.constant 0 : i32
    %c0_i32_0 = arith.constant 0 : i32
    return %arg0, %c0_i32 : i32, i32
  }
}

</mosaic_0001>

<bundles_post_ra>
// kernel: tpu_custom_call.1
= control target key start
LH: loop header
LB: loop body
LE: loop exit
PB: predicated region body
PF: predicated region fallthrough
CT: control target
= control target key end

     0   :  { %s87_s0 = inlined_call_operand.vmem [shape: f32[8,64], index: 0, kind: input, shape index: {}]   ;;  %s88_s1 = inlined_call_operand.vmem [shape: f32[64,32], index: 1, kind: input, shape index: {}]   ;;  %s89_s2 = inlined_call_operand.hbm [shape: f32[8,64], index: 2, kind: output, shape index: {}]  }
   0x1   :  { %v12_v0 = vld [vmem:[%s88_s1] sm:$0xff] }
   0x2   :  { %7 = vsyncpa [#allocation3], 0  ;;  %s61_s11 = smov 32   ;;  %vm17_vm0 = vcmask 261120   ;;  %v19_v1 = vld [vmem:[%s87_s0] sm:$0xff]  ;;  %s62_s14 = smov [#allocation2]  }
   0x3   :  { %14 = vrot.lane.b32.xlu0 %v12_v0, %s61_s11  ;;  %s29_s15 = sshll.u32 %s62_s14, 4  ;;  %vm21_vm1 = vcmask 523264   ;;  %s30_s15 = int_to_ptr.vmem [resolvable:$true] %s29_s15 }
   0x4   :  { %s39_s16 = scalar_lea.vmem %s30_s15, 128  ;;  %p44_p1 = scmp.lt.s32.totalorder %s30_s15, %s30_s15 }
   0x5   :  { %p40_p0 = scmp.ne.s32.totalorder %s30_s15, %s39_s16  ;;  %p45_p2 = scmp.lt.s32.totalorder %s39_s16, %s39_s16 }
   0x7   :  { %p46_p3 = por %p45_p2, %p44_p1 }
   0x9   :  { %p47_p4 = pnand %p46_p3, %p40_p0 }
  0x75   :  { %v15_v2 = vpop.permute.xlu0 %14 }
  0x76   :  { %v18_v3 = vsel %vm17_vm0, %v12_v0, %v15_v2 }
  0x77   :  { %v20_v4 = vadd.f32 %v19_v1, %v18_v3 }
  0x79   :  { %22 = vst.msk [vmem:[#allocation2] sm:$0xff] %vm21_vm1, %v20_v4 }
  0x7a   :  { %50 = shalt.err (!%p47_p4)
}
  0x7b   :  { %32 = dma.vmem_to_hbm [thread:$0]  %s30_s15, 128, %s89_s2, [#allocation3]  }
  0x7c   :  { %59 = dma.done.wait [#allocation3], 128  }
  0x7d   :  { %60 = vsyncadd [#allocation3], 4294967168 }
  0x7e   :  { %36 = vsyncpa [#allocation3], 1 }

</bundles_post_ra>
